<compile_context>
chip_gen: v7x
topology: tpu7x:2x2x1
jax: 0.10.0
libtpu: 0.0.40
codegen_flags: <defaults>
</compile_context>

<pallas_src>
import functools

import jax
import jax.numpy as jnp
from jax.experimental import pallas as pl
from jax.experimental.pallas import tpu as pltpu


# ---------------------------------------------------------------------------
# VMEM budgets (generation aware)
# ---------------------------------------------------------------------------
@functools.lru_cache(maxsize=None)
def _vmem_budgets():
    """(block_buffer_budget, scoped_vmem_limit) in bytes for this TPU gen."""
    try:
        cap = int(pltpu.get_tpu_info().vmem_capacity_bytes)
    except Exception:
        cap = 64 * 1024 * 1024          # conservative (v7x-sized) fallback
    limit = int(cap * 0.70)             # scoped limit w/ headroom
    budget = int(cap * 0.55)            # pipelined block buffers + temps
    return budget, limit


# ---------------------------------------------------------------------------
# Kernels
# ---------------------------------------------------------------------------
def _se_fused_kernel(x_ref, w1_ref, b1_ref, w2_ref, b2_ref, o_ref):
    """Squeeze + excite + rescale for one (TB, C, L) batch block."""
    x = x_ref[...]                                            # native dtype
    y = jnp.mean(x.astype(jnp.float32), axis=-1)              # (TB, C) f32
    h = jnp.dot(y, w1_ref[...], preferred_element_type=jnp.float32) + b1_ref[...]
    h = jnp.maximum(h, 0.0)
    s = jnp.dot(h, w2_ref[...], preferred_element_type=jnp.float32) + b2_ref[...]
    s = jax.nn.sigmoid(s)                                     # (TB, C) f32
    # Rescale natively in the input dtype (no full-slab f32 temp on the store).
    o_ref[...] = (x * s.astype(x.dtype)[:, :, None]).astype(o_ref.dtype)


def _squeeze_excite_kernel(x_ref, w1_ref, b1_ref, w2_ref, b2_ref, s_ref,
                           *, inv_l, l_total, tl, need_mask):
    """Pass 1: reduce x over L (grid axis 1, 'arbitrary'), then excite once."""
    l = pl.program_id(1)

    @pl.when(l == 0)
    def _init():
        s_ref[...] = jnp.zeros_like(s_ref)

    x = x_ref[...].astype(jnp.float32)                        # (TB, C, TL)
    if need_mask:
        # Last L tile reaches past the true L; zero the tail before summing.
        idx = jax.lax.broadcasted_iota(jnp.int32, x.shape, dimension=2) + l * tl
        x = jnp.where(idx < l_total, x, 0.0)
    # Partial sum; s_ref (TB, C, 1) stays VMEM-resident across the L axis.
    s_ref[...] += jnp.sum(x, axis=-1, keepdims=True)

    @pl.when(l == pl.num_programs(1) - 1)
    def _finalize():
        y = s_ref[...][:, :, 0] * inv_l                       # mean over true L
        h = jnp.dot(y, w1_ref[...], preferred_element_type=jnp.float32) + b1_ref[...]
        h = jnp.maximum(h, 0.0)
        s = jnp.dot(h, w2_ref[...], preferred_element_type=jnp.float32) + b2_ref[...]
        s_ref[...] = jax.nn.sigmoid(s)[:, :, None]            # overwrite acc w/ gate


def _rescale_kernel(x_ref, s_ref, o_ref):
    """Pass 2: memory-bound channel-wise rescale of a (TB, C, TL) tile."""
    x = x_ref[...]                                            # native dtype
    o_ref[...] = (x * s_ref[...].astype(x.dtype)).astype(o_ref.dtype)


# ---------------------------------------------------------------------------
# Glue
# ---------------------------------------------------------------------------
def make_quaternion_weight(r, i, j, k):
    """Dense (in, out) Hamilton-product weight from 4 (in/4, out/4) blocks,
    matching the standard QuaternionLinear (Parcollet et al.) construction."""
    col_r = jnp.concatenate([r, -i, -j, -k], axis=0)
    col_i = jnp.concatenate([i, r, -k, j], axis=0)
    col_j = jnp.concatenate([j, k, r, -i], axis=0)
    col_k = jnp.concatenate([k, -j, i, r], axis=0)
    return jnp.concatenate([col_r, col_i, col_j, col_k], axis=1)   # (in, out)


def _choose_tb(B, pipelined_row_bytes, block_row_bytes, block_budget,
               *, target_block_bytes, min_steps):
    """Batch tile: fit the budget, target ~4-8 MiB blocks, keep >= min_steps."""
    tb = max(1, min(B, block_budget // max(pipelined_row_bytes, 1)))
    tb = min(tb, max(1, target_block_bytes // max(block_row_bytes, 1)))
    steps = min(B, min_steps)
    if steps > 1:
        tb = min(tb, pl.cdiv(B, steps))
    return max(1, tb)


def _pick_two_pass_tiles(B, C, L, itemsize, block_budget):
    """Lane-dense L tile plus per-pass batch tiles for the two-pass path."""
    if L < 128:
        tl = L                                   # full-extent last dim
    else:
        tl = min((L // 128) * 128, 2048)         # 128-aligned, need not divide L
        while tl > 128 and 4 * C * tl * itemsize > block_budget:
            tl = max(128, ((tl // 2) // 128) * 128)

    # Pass 2: in + out double-buffered (4 copies of the x tile).
    row2_pipe = 4 * C * tl * itemsize
    row2_block = C * tl * itemsize
    tb2 = _choose_tb(B, row2_pipe, row2_block, block_budget,
                     target_block_bytes=4 << 20, min_steps=2)

    # Pass 1: only the input tile is double-buffered; add the f32 sum temp.
    row1_pipe = 2 * C * tl * itemsize + 4 * C * tl
    row1_block = C * tl * itemsize
    tb1 = _choose_tb(B, row1_pipe, row1_block, block_budget,
                     target_block_bytes=8 << 20, min_steps=2)
    return tb1, tb2, tl


def se_layer(x, w1, b1, w2, b2, *, force_two_pass=False):
    """SE forward. x: (B, C, L); w1: (C, H), b1: (H,), w2: (H, C), b2: (C,)."""
    B, C, L = x.shape
    H = w1.shape[1]
    w1 = w1.astype(jnp.float32)
    w2 = w2.astype(jnp.float32)
    b1_2d = b1.reshape(1, H).astype(jnp.float32)
    b2_2d = b2.reshape(1, C).astype(jnp.float32)

    itemsize = jnp.dtype(x.dtype).itemsize
    block_budget, vmem_limit = _vmem_budgets()

    # Fused path cost per batch row: 2x in + 2x out pipelined buffers in the
    # I/O dtype plus one f32 temp (the mean upcast) inside the kernel.
    per_row_fused = C * L * (4 * itemsize + 4)
    fused_ok = (not force_two_pass) and per_row_fused * min(B, 2) <= block_budget

    if fused_ok:
        tb = _choose_tb(B, per_row_fused, C * L * itemsize, block_budget,
                        target_block_bytes=4 << 20, min_steps=4)
        nb = pl.cdiv(B, tb)
        # Single HBM read + single write; excite runs once per batch block.
        # (For L < 128 stores are partially masked, but data volume is tiny.)
        return pl.pallas_call(
            _se_fused_kernel,
            out_shape=jax.ShapeDtypeStruct((B, C, L), x.dtype),
            grid_spec=pltpu.PrefetchScalarGridSpec(
                num_scalar_prefetch=0,
                grid=(nb,),
                in_specs=[
                    pl.BlockSpec((tb, C, L), lambda b: (b, 0, 0)),   # x
                    pl.BlockSpec((C, H), lambda b: (0, 0)),          # W1 (resident)
                    pl.BlockSpec((1, H), lambda b: (0, 0)),          # b1
                    pl.BlockSpec((H, C), lambda b: (0, 0)),          # W2
                    pl.BlockSpec((1, C), lambda b: (0, 0)),          # b2
                ],
                out_specs=pl.BlockSpec((tb, C, L), lambda b: (b, 0, 0)),
            ),
            compiler_params=pltpu.CompilerParams(
                dimension_semantics=("parallel",),
                vmem_limit_bytes=vmem_limit),
        )(x, w1, b1_2d, w2, b2_2d)

    # ---- Two-pass path (slab doesn't fit VMEM) ----
    tb1, tb2, tl = _pick_two_pass_tiles(B, C, L, itemsize, block_budget)
    nl = pl.cdiv(L, tl)
    need_mask = (L % tl) != 0

    # Pass 1: squeeze (mean over L) + excite -> per-channel gate s, (B, C, 1) f32.
    s = pl.pallas_call(
        functools.partial(_squeeze_excite_kernel,
                          inv_l=1.0 / L, l_total=L, tl=tl, need_mask=need_mask),
        out_shape=jax.ShapeDtypeStruct((B, C, 1), jnp.float32),
        grid_spec=pltpu.PrefetchScalarGridSpec(
            num_scalar_prefetch=0,
            grid=(pl.cdiv(B, tb1), nl),
            in_specs=[
                pl.BlockSpec((tb1, C, tl), lambda b, l: (b, 0, l)),  # x tile
                pl.BlockSpec((C, H), lambda b, l: (0, 0)),
                pl.BlockSpec((1, H), lambda b, l: (0, 0)),
                pl.BlockSpec((H, C), lambda b, l: (0, 0)),
                pl.BlockSpec((1, C), lambda b, l: (0, 0)),
            ],
            out_specs=pl.BlockSpec((tb1, C, 1), lambda b, l: (b, 0, 0)),  # resident acc
        ),
        compiler_params=pltpu.CompilerParams(
            dimension_semantics=("parallel", "arbitrary"),
            vmem_limit_bytes=vmem_limit),
    )(x, w1, b1_2d, w2, b2_2d)

    # Pass 2: memory-bound rescale over lane-dense (tb2, C, tl) tiles.
    return pl.pallas_call(
        _rescale_kernel,
        out_shape=jax.ShapeDtypeStruct((B, C, L), x.dtype),
        grid_spec=pltpu.PrefetchScalarGridSpec(
            num_scalar_prefetch=0,
            grid=(pl.cdiv(B, tb2), nl),
            in_specs=[
                pl.BlockSpec((tb2, C, tl), lambda b, l: (b, 0, l)),  # x tile
                pl.BlockSpec((tb2, C, 1), lambda b, l: (b, 0, 0)),   # gate
            ],
            out_specs=pl.BlockSpec((tb2, C, tl), lambda b, l: (b, 0, l)),
        ),
        compiler_params=pltpu.CompilerParams(
            dimension_semantics=("parallel", "parallel"),
            vmem_limit_bytes=vmem_limit),
    )(x, s)


def se_layer_ref(x, w1, b1, w2, b2):
    xf = x.astype(jnp.float32)
    y = jnp.mean(xf, axis=-1)
    h = jnp.maximum(y @ w1 + b1, 0.0)
    s = jax.nn.sigmoid(h @ w2 + b2)
    return xf * s[:, :, None]


# ---------------------------------------------------------------------------
# Demo / checks
# ---------------------------------------------------------------------------
if __name__ == "__main__":
    key = jax.random.PRNGKey(0)

    def make_params(k, C, H):
        k1r, k1i, k1j, k1k, k2r, k2i, k2j, k2k, kb1, kb2 = jax.random.split(k, 10)
        s1 = 1.0 / jnp.sqrt(jnp.float32(C))
        w1 = make_quaternion_weight(
            jax.random.normal(k1r, (C // 4, H // 4), jnp.float32) * s1,
            jax.random.normal(k1i, (C // 4, H // 4), jnp.float32) * s1,
            jax.random.normal(k1j, (C // 4, H // 4), jnp.float32) * s1,
            jax.random.normal(k1k, (C // 4, H // 4), jnp.float32) * s1)
        s2 = 1.0 / jnp.sqrt(jnp.float32(H))
        w2 = make_quaternion_weight(
            jax.random.normal(k2r, (H // 4, C // 4), jnp.float32) * s2,
            jax.random.normal(k2i, (H // 4, C // 4), jnp.float32) * s2,
            jax.random.normal(k2j, (H // 4, C // 4), jnp.float32) * s2,
            jax.random.normal(k2k, (H // 4, C // 4), jnp.float32) * s2)
        b1 = jax.random.normal(kb1, (H,), jnp.float32) * 0.01
        b2 = jax.random.normal(kb2, (C,), jnp.float32) * 0.01
        return w1, b1, w2, b2

    # --- Test 1: fused path, SELayer(channel=64, reduction=16), small L ---
    kx, kp, key = jax.random.split(key, 3)
    B, C, L, reduction = 4, 64, 16, 16
    H = C // reduction
    w1, b1, w2, b2 = make_params(kp, C, H)
    x = jax.random.normal(kx, (B, C, L), jnp.float32)
    out = jax.block_until_ready(se_layer(x, w1, b1, w2, b2))
    ref = se_layer_ref(x, w1, b1, w2, b2)
    assert out.shape == (B, C, L)
    assert jnp.allclose(out, ref, atol=1e-5, rtol=1e-5), "fused f32 mismatch"

    # --- Test 2: moderate L now takes the fused (single-read) path ---
    kx, kp, key = jax.random.split(key, 3)
    B, C, L = 8, 64, 1024
    H = C // 16
    w1, b1, w2, b2 = make_params(kp, C, H)
    x = jax.random.normal(kx, (B, C, L), jnp.float32)
    out = jax.block_until_ready(se_layer(x, w1, b1, w2, b2))
    ref = se_layer_ref(x, w1, b1, w2, b2)
    assert out.shape == (B, C, L)
    assert jnp.allclose(out, ref, atol=1e-4, rtol=1e-4), "fused moderate-L mismatch"

    # --- Test 3: bf16 I/O (f32 mean/excite, native bf16 rescale) ---
    kx, kp, key = jax.random.split(key, 3)
    B, C, L = 2, 64, 256
    H = C // 16
    w1, b1, w2, b2 = make_params(kp, C, H)
    x = jax.random.normal(kx, (B, C, L), jnp.float32).astype(jnp.bfloat16)
    out = jax.block_until_ready(se_layer(x, w1, b1, w2, b2))
    ref = se_layer_ref(x, w1, b1, w2, b2)
    assert out.dtype == jnp.bfloat16
    assert jnp.allclose(out.astype(jnp.float32), ref, atol=2e-2, rtol=2e-2), "bf16 mismatch"

    # --- Test 4: two-pass path with ragged L (not a multiple of 128) ---
    kx, kp, key = jax.random.split(key, 3)
    B, C, L = 4, 64, 1000
    H = C // 16
    w1, b1, w2, b2 = make_params(kp, C, H)
    x = jax.random.normal(kx, (B, C, L), jnp.float32)
    out = jax.block_until_ready(se_layer(x, w1, b1, w2, b2, force_two_pass=True))
    ref = se_layer_ref(x, w1, b1, w2, b2)
    assert out.shape == (B, C, L)
    assert jnp.allclose(out, ref, atol=1e-4, rtol=1e-4), "two-pass ragged-L mismatch"

    print("KERNEL_OK")
</pallas_src>

<mosaic_0001>
module attributes {stable_mosaic.version = 11 : i64} {
  func.func @_se_fused_kernel(%arg0: i32, %arg1: memref<1x64x16xf32, #tpu.memory_space<vmem>>, %arg2: memref<64x4xf32, #tpu.memory_space<vmem>>, %arg3: memref<1x4xf32, #tpu.memory_space<vmem>>, %arg4: memref<4x64xf32, #tpu.memory_space<vmem>>, %arg5: memref<1x64xf32, #tpu.memory_space<vmem>>, %arg6: memref<1x64x16xf32, #tpu.memory_space<vmem>>) attributes {dimension_semantics = [#tpu.dimension_semantics<parallel>], iteration_bounds = array<i64: 4>, scalar_prefetch = 0 : i64, scratch_operands = 0 : i64, tpu.core_type = #tpu.core_type<tc>, window_params = [{transform_indices = @transform_0, window_bounds = array<i64: 1, 64, 16>}, {pipeline_mode = #tpu.pipeline_mode<synchronous>, transform_indices = @transform_1, window_bounds = array<i64: 64, 4>}, {pipeline_mode = #tpu.pipeline_mode<synchronous>, transform_indices = @transform_2, window_bounds = array<i64: 1, 4>}, {pipeline_mode = #tpu.pipeline_mode<synchronous>, transform_indices = @transform_3, window_bounds = array<i64: 4, 64>}, {pipeline_mode = #tpu.pipeline_mode<synchronous>, transform_indices = @transform_4, window_bounds = array<i64: 1, 64>}, {transform_indices = @transform_5, window_bounds = array<i64: 1, 64, 16>}]} {
    %c0 = arith.constant 0 : index
    %c0_0 = arith.constant 0 : index
    %c0_1 = arith.constant 0 : index
    %0 = vector.load %arg1[%c0, %c0_0, %c0_1] : memref<1x64x16xf32, #tpu.memory_space<vmem>>, vector<1x64x16xf32>
    %cst = arith.constant dense<0.000000e+00> : vector<1x64xf32>
    %1 = vector.multi_reduction <add>, %0, %cst [2] : vector<1x64x16xf32> to vector<1x64xf32>
    %cst_2 = arith.constant 1.600000e+01 : f32
    %2 = vector.broadcast %cst_2 : f32 to vector<1x64xf32>
    %3 = arith.divf %1, %2 : vector<1x64xf32>
    %c0_3 = arith.constant 0 : index
    %c0_4 = arith.constant 0 : index
    %4 = vector.load %arg2[%c0_3, %c0_4] : memref<64x4xf32, #tpu.memory_space<vmem>>, vector<64x4xf32>
    %cst_5 = arith.constant dense<0.000000e+00> : vector<1x4xf32>
    %5 = tpu.matmul %3, %4, %cst_5 {dimension_numbers = #tpu.dot_dimension_numbers<[1], [0], [0], [1], [0, 0, 1, 1], [], []>} : vector<1x64xf32>, vector<64x4xf32>, vector<1x4xf32> -> vector<1x4xf32>
    %c0_6 = arith.constant 0 : index
    %c0_7 = arith.constant 0 : index
    %6 = vector.load %arg3[%c0_6, %c0_7] : memref<1x4xf32, #tpu.memory_space<vmem>>, vector<1x4xf32>
    %7 = arith.addf %5, %6 : vector<1x4xf32>
    %cst_8 = arith.constant 0.000000e+00 : f32
    %8 = vector.broadcast %cst_8 : f32 to vector<1x4xf32>
    %9 = arith.maximumf %7, %8 : vector<1x4xf32>
    %c0_9 = arith.constant 0 : index
    %c0_10 = arith.constant 0 : index
    %10 = vector.load %arg4[%c0_9, %c0_10] : memref<4x64xf32, #tpu.memory_space<vmem>>, vector<4x64xf32>
    %cst_11 = arith.constant dense<0.000000e+00> : vector<1x64xf32>
    %11 = tpu.matmul %9, %10, %cst_11 {dimension_numbers = #tpu.dot_dimension_numbers<[1], [0], [0], [1], [0, 0, 1, 1], [], []>} : vector<1x4xf32>, vector<4x64xf32>, vector<1x64xf32> -> vector<1x64xf32>
    %c0_12 = arith.constant 0 : index
    %c0_13 = arith.constant 0 : index
    %12 = vector.load %arg5[%c0_12, %c0_13] : memref<1x64xf32, #tpu.memory_space<vmem>>, vector<1x64xf32>
    %13 = arith.addf %11, %12 : vector<1x64xf32>
    %14 = arith.negf %13 : vector<1x64xf32>
    %15 = math.exp %14 : vector<1x64xf32>
    %cst_14 = arith.constant 1.000000e+00 : f32
    %16 = vector.broadcast %cst_14 : f32 to vector<1x64xf32>
    %17 = arith.addf %16, %15 : vector<1x64xf32>
    %18 = arith.divf %16, %17 : vector<1x64xf32>
    %19 = vector.shape_cast %18 : vector<1x64xf32> to vector<1x64x1xf32>
    %20 = vector.broadcast %19 : vector<1x64x1xf32> to vector<1x64x16xf32>
    %21 = arith.mulf %0, %20 : vector<1x64x16xf32>
    %c0_15 = arith.constant 0 : index
    %c0_16 = arith.constant 0 : index
    %c0_17 = arith.constant 0 : index
    %22 = vector.load %arg6[%c0_15, %c0_16, %c0_17] : memref<1x64x16xf32, #tpu.memory_space<vmem>>, vector<1x64x16xf32>
    tpu.vector_store %arg6[%c0_15, %c0_16, %c0_17], %21 {strides = array<i32>} : memref<1x64x16xf32, #tpu.memory_space<vmem>>, vector<1x64x16xf32>,
    return
  }
  func.func @transform_0(%arg0: i32) -> (i32, i32, i32) {
    %c0_i32 = arith.constant 0 : i32
    %c0_i32_0 = arith.constant 0 : i32
    %c0_i32_1 = arith.constant 0 : i32
    return %arg0, %c0_i32, %c0_i32_0 : i32, i32, i32
  }
  func.func @transform_1(%arg0: i32) -> (i32, i32) {
    %c0_i32 = arith.constant 0 : i32
    %c0_i32_0 = arith.constant 0 : i32
    %c0_i32_1 = arith.constant 0 : i32
    return %c0_i32, %c0_i32_0 : i32, i32
  }
  func.func @transform_2(%arg0: i32) -> (i32, i32) {
    %c0_i32 = arith.constant 0 : i32
    %c0_i32_0 = arith.constant 0 : i32
    %c0_i32_1 = arith.constant 0 : i32
    return %c0_i32, %c0_i32_0 : i32, i32
  }
  func.func @transform_3(%arg0: i32) -> (i32, i32) {
    %c0_i32 = arith.constant 0 : i32
    %c0_i32_0 = arith.constant 0 : i32
    %c0_i32_1 = arith.constant 0 : i32
    return %c0_i32, %c0_i32_0 : i32, i32
  }
  func.func @transform_4(%arg0: i32) -> (i32, i32) {
    %c0_i32 = arith.constant 0 : i32
    %c0_i32_0 = arith.constant 0 : i32
    %c0_i32_1 = arith.constant 0 : i32
    return %c0_i32, %c0_i32_0 : i32, i32
  }
  func.func @transform_5(%arg0: i32) -> (i32, i32, i32) {
    %c0_i32 = arith.constant 0 : i32
    %c0_i32_0 = arith.constant 0 : i32
    %c0_i32_1 = arith.constant 0 : i32
    return %arg0, %c0_i32, %c0_i32_0 : i32, i32, i32
  }
}

</mosaic_0001>

<bundles_post_ra>
// kernel: tpu_custom_call.1
= control target key start
LH: loop header
LB: loop body
LE: loop exit
PB: predicated region body
PF: predicated region fallthrough
CT: control target
= control target key end

     0   :  { %s725_s18 = smov 0   ;;  %s841_s0 = inlined_call_operand.vmem [shape: f32[4,64,16], index: 0, kind: input, shape index: {}]   ;;  %s842_s1 = inlined_call_operand.vmem [shape: f32[64,4], index: 1, kind: input, shape index: {}]   ;;  %s843_s2 = inlined_call_operand.vmem [shape: f32[1,4], index: 2, kind: input, shape index: {}]   ;;  %s844_s3 = inlined_call_operand.vmem [shape: f32[4,64], index: 3, kind: input, shape index: {}]   ;;  %s845_s4 = inlined_call_operand.vmem [shape: f32[1,64], index: 4, kind: input, shape index: {}]   ;;  %s846_s5 = inlined_call_operand.vmem [shape: f32[4,64,16], index: 5, kind: output, shape index: {}]  }
   0x1 LB: > { %s605_s19 = sadd.s32 4294967295, %s690_s18   ;;  %p609_p0 = scmp.ge.s32.totalorder %s690_s18, 1  ;;  %s690_s18 = sphi %s725_s18, %s15_s18  }
   0x2   : > { %p187_p1 = scmp.lt.s32.totalorder %s690_s18, 5 }
   0x4   : > { %p188_p2 = pnand %p609_p0, %p187_p1 }
   0x5   : > { %p215_p3 = scmp.lt.s32.totalorder (!%p188_p2), %s605_s19, 3  ;;  %vm233_vm0 = vcmask (!%p188_p2), 130048   ;;  %v267_v16 = vld [vmem:[%s842_s1] sm:$0xff] (!%p188_p2)  ;;  %v268_v17 = vld [vmem:[%s842_s1 + $0x8] sm:$0xff] (!%p188_p2)  ;;  %v692_v19 = vmov (!%p188_p2), 0.0|0.0   ;;  %v269_v20 = vld [vmem:[%s842_s1 + $0x10] sm:$0xff] (!%p188_p2)  ;;  %v284_v30 = vlaneseq (!%p188_p2) }
   0x6   : > { %191 = sbr.rel (%p188_p2) target bundleno = 770 (0x302), region = 40  ;;  %v658_v18 = vpack.c.bf16 (!%p188_p2), %v268_v17, %v267_v16  ;;  %657 = vmatprep.subr.bf16.mxu0 (!%p188_p2), %v692_v19  ;;  %v270_v21 = vld [vmem:[%s842_s1 + $0x18] sm:$0xff] (!%p188_p2)  ;;  %v271_v23 = vld [vmem:[%s842_s1 + $0x20] sm:$0xff] (!%p188_p2)  ;;  %v272_v24 = vld [vmem:[%s842_s1 + $0x28] sm:$0xff] (!%p188_p2)  ;;  %vm693_vm1 = vmmov (!%p188_p2), 0   ;;  %v694_v29 = vmov (!%p188_p2), 0.0  }
   0x7   : > { %v661_v22 = vpack.c.bf16 (!%p188_p2), %v270_v21, %v269_v20  ;;  %v664_v25 = vpack.c.bf16 (!%p188_p2), %v272_v24, %v271_v23  ;;  %v273_v26 = vld [vmem:[%s842_s1 + $0x30] sm:$0xff] (!%p188_p2)  ;;  %v274_v27 = vld [vmem:[%s842_s1 + $0x38] sm:$0xff] (!%p188_p2)  ;;  %649 = vmatprep.mubr.msk.f32.mxu0 (!%p188_p2), %vm693_vm1, %v694_v29  ;;  %652 = vmatprep.subr.mxu1 (!%p188_p2), %v694_v29  ;;  %v285_v31 = vand.u32 (!%p188_p2), 127, %v284_v30  ;;  %v797_v32 = vshrl.u32 (!%p188_p2), %v284_v30, 7  ;;  %v413_v23 = vld [vmem:[%s844_s3] sm:$0xf] (!%p188_p2) }
   0x8   : > { %659 = vmatpush3.bf16.msra.mxu0 (!%p188_p2), %v658_v18  ;;  %v667_v28 = vpack.c.bf16 (!%p188_p2), %v274_v27, %v273_v26  ;;  %654 = vmatprep.mubr.msk.f32.mxu1 (!%p188_p2), %vm693_vm1, %v694_v29  ;;  %vm295_vm2 = vcmask (!%p188_p2), 130112   ;;  %vm302_vm3 = vcmask (!%p188_p2), 195712   ;;  %vm309_vm4 = vcmask (!%p188_p2), 261312   ;;  %v275_v24 = vld [vmem:[%s843_s2] sm:$0x1] (!%p188_p2) }
   0x9   : > { %660 = vmatprep.subr.bf16.mxu0 (!%p188_p2), %v692_v19  ;;  %v290_v33 = vadd.s32 (!%p188_p2), 4294967288, %v285_v31  ;;  %v304_v34 = vadd.s32 (!%p188_p2), 4294967272, %v285_v31  ;;  %v297_v36 = vadd.s32 (!%p188_p2), 4294967280, %v285_v31  ;;  %v311_v38 = vadd.s32 (!%p188_p2), 4294967264, %v285_v31  ;;  %v414_v29 = vld [vmem:[%s845_s4] sm:$0x1] (!%p188_p2) }
   0xa   : > { %v288_v39 = vsub.s32 (!%p188_p2), %v285_v31, %v797_v32  ;;  %v318_v47 = vadd.s32 (!%p188_p2), 4294967256, %v285_v31  ;;  %v325_v51 = vadd.s32 (!%p188_p2), 4294967248, %v285_v31  ;;  %v332_v55 = vadd.s32 (!%p188_p2), 4294967240, %v285_v31 }
   0xb   : > { %v293_v41 = vsub.s32 (!%p188_p2), %v290_v33, %v797_v32  ;;  %v307_v42 = vsub.s32 (!%p188_p2), %v304_v34, %v797_v32  ;;  %v300_v43 = vsub.s32 (!%p188_p2), %v297_v36, %v797_v32  ;;  %v314_v50 = vsub.s32 (!%p188_p2), %v311_v38, %v797_v32 }
   0xc   : > { %662 = vmatpush3.bf16.msra.mxu0 (!%p188_p2), %v661_v22  ;;  %v321_v58 = vsub.s32 (!%p188_p2), %v318_v47, %v797_v32  ;;  %vm316_vm5 = vcmask (!%p188_p2), 326912   ;;  %vm323_vm6 = vcmask (!%p188_p2), 392512   ;;  %vm330_vm7 = vcmask (!%p188_p2), 458112  }
   0xd   : > { %s848_s19 = smov (!%p215_p3, %s605_s19), 3  ;;  %663 = vmatprep.subr.bf16.mxu0 %v692_v19  ;;  %vm337_vm8 = vcmask 523712   ;;  %vm339_vm9 = vcmask 523264   ;;  %vm419_vm10 = vcmask 1043456   ;;  %vm415_vm11 = vcmask 31744  }
   0xe   : > { %s620_s20 = sshll.u32 %s848_s19, 6  ;;  %653 = vmatpush3.msk.msra.mxu1 %vm419_vm10, %v413_v23 }
   0xf   : > { %s219_s23 = scalar_lea.vmem %s841_s0, %s620_s20  ;;  %s224_s26 = scalar_lea.vmem %s846_s5, %s620_s20 }
  0x10   : > { %v741_v0 = vld [vmem:[%s219_s23] sm:$0xff]  ;;  %v743_v1 = vld [vmem:[%s219_s23 + $0x10] sm:$0xff]  ;;  %v745_v2 = vld [vmem:[%s219_s23 + $0x8] sm:$0xff]  ;;  %665 = vmatpush3.bf16.msra.mxu0 %v664_v25 }
  0x11   : > { %v234_v3 = vsel %vm233_vm0, %v741_v0, 0.0  ;;  %v240_v4 = vsel %vm233_vm0, %v743_v1, 0.0  ;;  %v751_v5 = vld [vmem:[%s219_s23 + $0x18] sm:$0xff]  ;;  %v237_v6 = vsel %vm233_vm0, %v745_v2, 0.0  ;;  %v757_v8 = vld [vmem:[%s219_s23 + $0x20] sm:$0xff]  ;;  %v759_v9 = vld [vmem:[%s219_s23 + $0x28] sm:$0xff]  ;;  %666 = vmatprep.subr.bf16.mxu0 %v692_v19 }
  0x12   : > { %235 = vadd.xlane.f32.xlu0 %v234_v3  ;;  %241 = vadd.xlane.f32.xlu1 %v240_v4  ;;  %v243_v7 = vsel %vm233_vm0, %v751_v5, 0.0  ;;  %v246_v10 = vsel %vm233_vm0, %v757_v8, 0.0  ;;  %v249_v11 = vsel %vm233_vm0, %v759_v9, 0.0  ;;  %v765_v12 = vld [vmem:[%s219_s23 + $0x30] sm:$0xff]  ;;  %v767_v13 = vld [vmem:[%s219_s23 + $0x38] sm:$0xff] }
  0x13   : > { %v252_v14 = vsel %vm233_vm0, %v765_v12, 0.0  ;;  %v255_v15 = vsel %vm233_vm0, %v767_v13, 0.0 }
  0x14   : > { %668 = vmatpush3.bf16.msra.mxu0 %v667_v28 }
  0x16   : > { %238 = vadd.xlane.f32.xlu0 %v237_v6  ;;  %244 = vadd.xlane.f32.xlu1 %v243_v7  ;;  %v328_v6 = vsub.s32 %v325_v51, %v797_v32  ;;  %v335_v7 = vsub.s32 %v332_v55, %v797_v32 }
  0x1a   : > { %247 = vadd.xlane.f32.xlu0 %v246_v10  ;;  %250 = vadd.xlane.f32.xlu1 %v249_v11 }
  0x1e   : > { %253 = vadd.xlane.f32.xlu0 %v252_v14  ;;  %256 = vadd.xlane.f32.xlu1 %v255_v15 }
  0x9f   : > { %v236_v35 = vpop.xlane.xlu0 %235  ;;  %v242_v37 = vpop.xlane.xlu1 %241 }
  0xa0   : > { %v259_v40 = vmul.f32 0.0625, %v236_v35  ;;  %v261_v44 = vmul.f32 0.0625, %v242_v37  ;;  %v501_v37 = vsub.s32 0, %v797_v32 }
  0xa2   : > { %v289_v52 = vrot.slane %v259_v40, %v288_v39  ;;  %v301_v56 = vrot.slane %v261_v44, %v300_v43 }
  0xa3   : > { %v239_v45 = vpop.xlane.xlu0 %238  ;;  %v245_v46 = vpop.xlane.xlu1 %244 }
  0xa4   : > { %v260_v48 = vmul.f32 0.0625, %v239_v45  ;;  %v262_v49 = vmul.f32 0.0625, %v245_v46 }
  0xa6   : > { %v294_v53 = vrot.slane %v260_v48, %v293_v41  ;;  %v308_v54 = vrot.slane %v262_v49, %v307_v42 }
  0xa7   : > { %v248_v57 = vpop.xlane.xlu0 %247  ;;  %v251_v59 = vpop.xlane.xlu1 %250 }
  0xa8   : > { %v296_v60 = vsel %vm295_vm2, %v294_v53, %v289_v52  ;;  %v263_v61 = vmul.f32 0.0625, %v248_v57  ;;  %v264_v62 = vmul.f32 0.0625, %v251_v59 }
  0xa9   : > { %v303_v63 = vsel %vm302_vm3, %v301_v56, %v296_v60 }
  0xaa   : > { %v310_v3 = vsel %vm309_vm4, %v308_v54, %v303_v63  ;;  %v315_v4 = vrot.slane %v263_v61, %v314_v50  ;;  %v322_v10 = vrot.slane %v264_v62, %v321_v58 }
  0xab   : > { %v254_v11 = vpop.xlane.xlu0 %253  ;;  %v257_v14 = vpop.xlane.xlu1 %256 }
  0xac   : > { %v317_v15 = vsel %vm316_vm5, %v315_v4, %v310_v3  ;;  %v265_v16 = vmul.f32 0.0625, %v254_v11  ;;  %v266_v17 = vmul.f32 0.0625, %v257_v14 }
  0xad   : > { %v324_v20 = vsel %vm323_vm6, %v322_v10, %v317_v15 }
  0xae   : > { %v329_v18 = vrot.slane %v265_v16, %v328_v6  ;;  %v336_v19 = vrot.slane %v266_v17, %v335_v7 }
  0xb0   : > { %v331_v21 = vsel %vm330_vm7, %v329_v18, %v324_v20 }
  0xb1   : > { %v338_v22 = vsel %vm337_vm8, %v336_v19, %v331_v21 }
  0xb2   : > { %650 = vmatmul.mubr.msk.f32.vlgmr.msra.gmra.mrb[0].mxu0 %vm339_vm9, %v338_v22 }
 0x185   : > { %v408_v25 = vpop.f32.mrb[0].mxu0 }
 0x186   : > { %v409_v26 = vadd.f32 %v408_v25, %v275_v24  ;;  %v651_v27 = vpop.f32.mrb[1].mxu0 }
 0x188   : > { %v412_v28 = vmax.f32 %v409_v26, 0.0 }
 0x18a   : > { %655 = vmatmul.mubr.msk.f32.vlgmr.msra.gmra.mrb[0].mxu1 %vm415_vm11, %v412_v28 }
 0x25d   : > { %v489_v30 = vpop.f32.mrb[0].mxu1 }
 0x25e   : > { %v490_v31 = vadd.f32 %v489_v30, %v414_v29  ;;  %v656_v33 = vpop.f32.mrb[1].mxu1 }
 0x260   : > { %v617_v34 = vmul.f32 -1.442695, %v490_v31 }
 0x262   : > { %680 = vpow2.f32 %v617_v34 }
 0x26c   : > { %v681_v35 = vpop.eup %680 }
 0x26d   : > { %v496_v36 = vadd.f32 1.0, %v681_v35 }
 0x26f   : > { %682 = vrcp.f32 %v496_v36 }
 0x279   : > { %v683_v38 = vpop.eup %682 }
 0x27a   : > { %v502_v39 = vrot.slane %v683_v38, %v501_v37 }
 0x27c   : > { %508 = vbcast.lane.b32.xlu1 %v502_v39, 264  ;;  %504 = vbcast.lane.b32.xlu0 %v502_v39, 256 }
 0x280   : > { %512 = vbcast.lane.b32.xlu1 %v502_v39, 272  ;;  %520 = vbcast.lane.b32.xlu0 %v502_v39, 288 }
 0x284   : > { %516 = vbcast.lane.b32.xlu1 %v502_v39, 280  ;;  %528 = vbcast.lane.b32.xlu0 %v502_v39, 304 }
 0x288   : > { %524 = vbcast.lane.b32.xlu1 %v502_v39, 296 }
 0x28c   : > { %532 = vbcast.lane.b32.xlu1 %v502_v39, 312 }
 0x2ee   : > { %v509_v40 = vpop.permute.xlu1 %508  ;;  %v505_v41 = vpop.permute.xlu0 %504 }
 0x2ef   : > { %v535_v42 = vmul.f32 %v509_v40, %v745_v2  ;;  %v534_v32 = vmul.f32 %v505_v41, %v741_v0 }
 0x2f1   : > { %543 = vst.msk [vmem:[%s224_s26 + $0x8] sm:$0xff] %vm233_vm0, %v535_v42  ;;  %542 = vst.msk [vmem:[%s224_s26] sm:$0xff] %vm233_vm0, %v534_v32 }
 0x2f2   : > { %v513_v43 = vpop.permute.xlu1 %512  ;;  %v521_v44 = vpop.permute.xlu0 %520 }
 0x2f3   : > { %v536_v45 = vmul.f32 %v513_v43, %v743_v1  ;;  %v538_v46 = vmul.f32 %v521_v44, %v757_v8 }
 0x2f5   : > { %544 = vst.msk [vmem:[%s224_s26 + $0x10] sm:$0xff] %vm233_vm0, %v536_v45  ;;  %546 = vst.msk [vmem:[%s224_s26 + $0x20] sm:$0xff] %vm233_vm0, %v538_v46 }
 0x2f6   : > { %v517_v47 = vpop.permute.xlu1 %516  ;;  %v529_v48 = vpop.permute.xlu0 %528 }
 0x2f7   : > { %v537_v2 = vmul.f32 %v517_v47, %v751_v5  ;;  %v540_v0 = vmul.f32 %v529_v48, %v765_v12 }
 0x2f9   : > { %545 = vst.msk [vmem:[%s224_s26 + $0x18] sm:$0xff] %vm233_vm0, %v537_v2  ;;  %548 = vst.msk [vmem:[%s224_s26 + $0x30] sm:$0xff] %vm233_vm0, %v540_v0 }
 0x2fa   : > { %v525_v49 = vpop.permute.xlu1 %524 }
 0x2fb   : > { %v539_v50 = vmul.f32 %v525_v49, %v759_v9 }
 0x2fd   : > { %547 = vst.msk [vmem:[%s224_s26 + $0x28] sm:$0xff] %vm233_vm0, %v539_v50 }
 0x2fe   : > { %v533_v1 = vpop.permute.xlu1 %532 }
 0x2ff   : > { %v541_v8 = vmul.f32 %v533_v1, %v767_v13 }
 0x301   : > { %549 = vst.msk [vmem:[%s224_s26 + $0x38] sm:$0xff] %vm233_vm0, %v541_v8 }
 0x302 PF: > { %s15_s18 = sadd.s32 1, %s690_s18  }
 0x303   : > { %p12_p4 = scmp.ge.s32.totalorder %s15_s18, 6  }
 0x305   :  { %14 = sbr.rel (!%p12_p4) target bundleno = 1 (0x1), region = 70 }

</bundles_post_ra>
